<compile_context>
chip_gen: v7x
topology: tpu7x:2x2x1
jax: 0.10.0
libtpu: 0.0.40
codegen_flags: <defaults>
</compile_context>

<pallas_src>
import functools
import math

import jax
import jax.numpy as jnp
import numpy as np
from jax import lax
from jax.experimental import pallas as pl
from jax.experimental.pallas import tpu as pltpu


# ---------------------------------------------------------------------------
# Flash-tiled scaled-dot-product-attention kernel (channel-major tiles).
# Grid: (batch, q_tiles, kv_tiles); kv axis is the "arbitrary" reduction axis.
# ---------------------------------------------------------------------------
def _sa_flash_kernel(x1q_ref, x1k_ref, x2v_ref,
                     wq_ref, bq_ref, wk_ref, bk_ref, wv_ref, bv_ref,
                     wo_ref, bo_ref,
                     o_ref,
                     m_ref, l_ref, acc_ref,
                     *, h, d_k, d_v):
    ki = pl.program_id(2)
    n_kv = pl.num_programs(2)

    @pl.when(ki == 0)
    def _init():
        m_ref[...] = jnp.full(m_ref.shape, -jnp.inf, dtype=m_ref.dtype)
        l_ref[...] = jnp.zeros(l_ref.shape, dtype=l_ref.dtype)
        acc_ref[...] = jnp.zeros(acc_ref.shape, dtype=acc_ref.dtype)

    # Channel-major tiles: (d_model, tq) / (d_model, tk). bf16 MXU operands,
    # f32 accumulation (preferred_element_type) on every matmul.
    xq = x1q_ref[...].astype(jnp.bfloat16)
    xk = x1k_ref[...].astype(jnp.bfloat16)
    xv = x2v_ref[...].astype(jnp.bfloat16)
    tq = xq.shape[-1]
    tk = xk.shape[-1]

    # Projections. Weights are PyTorch-native (out, in) layout (bf16); the
    # 1/sqrt(d_k) scale is pre-folded into wq/bq. Outputs are (h*d, tile) —
    # seq on lanes — so the per-head split is a free leading-dim reshape.
    # (Re-projecting K/V per q-tile costs ~12% extra MXU flops vs. the n*n
    #  matmuls; acceptable, avoids persistent K/V scratch.)
    q = (jnp.dot(wq_ref[...], xq, preferred_element_type=jnp.float32)
         + bq_ref[...]).reshape(h, d_k, tq).astype(jnp.bfloat16)
    k = (jnp.dot(wk_ref[...], xk, preferred_element_type=jnp.float32)
         + bk_ref[...]).reshape(h, d_k, tk).astype(jnp.bfloat16)
    v = (jnp.dot(wv_ref[...], xv, preferred_element_type=jnp.float32)
         + bv_ref[...]).reshape(h, d_v, tk).astype(jnp.bfloat16)

    # Scores in (h, tk, tq): keys on sublanes, queries on lanes. Softmax stats
    # are (h, 1, tq) lane rows, the P@V and output-projection matmuls are
    # natural MXU gemms, and the output store is channel-major directly.
    s = lax.dot_general(k, q, (((1,), (1,)), ((0,), (0,))),
                        preferred_element_type=jnp.float32)        # (h, tk, tq)

    m_prev = m_ref[...]
    m_cur = jnp.max(s, axis=1, keepdims=True)                      # (h, 1, tq)
    m_new = jnp.maximum(m_prev, m_cur)
    alpha = jnp.exp(m_prev - m_new)                                # (h, 1, tq)
    p = jnp.exp(s - m_new)                                         # f32

    l_ref[...] = alpha * l_ref[...] + jnp.sum(p, axis=1, keepdims=True)
    acc_ref[...] = alpha * acc_ref[...] + lax.dot_general(
        v, p.astype(jnp.bfloat16), (((2,), (1,)), ((0,), (0,))),
        preferred_element_type=jnp.float32)                        # (h, d_v, tq)
    m_ref[...] = m_new

    @pl.when(ki == n_kv - 1)
    def _finalize():
        # Deferred softmax normalization; approx EUP reciprocal (eval-mode
        # accuracy — use approx=False if this path ever feeds backprop).
        att = acc_ref[...] * pl.reciprocal(l_ref[...], approx=True)
        att = att.reshape(h * d_v, tq).astype(jnp.bfloat16)
        out = jnp.dot(wo_ref[...], att,
                      preferred_element_type=jnp.float32) + bo_ref[...]
        o_ref[...] = out.astype(o_ref.dtype)                       # (d_model, tq)


# ---------------------------------------------------------------------------
# Tile / VMEM sizing helpers.
# ---------------------------------------------------------------------------
def _pick_seq_tile(n):
    # MXU-matched tiles: 256 feeds the 2x256^2 MXU (v6e/v7x) and is fine on v5e.
    for t in (256, 128):
        if n >= t and n % t == 0:
            return t
    return n  # small or ragged n: single tile (see TODO in header)


def _vmem_limit_bytes():
    # Generation-aware budget: ~48 MiB on 128 MiB parts (v5e/v6e), ~38 MiB on
    # v7x (64 MiB per TensorCore).
    cap = 128 * 1024 * 1024
    try:
        cap = pltpu.get_tpu_info().vmem_capacity_bytes
    except Exception:
        pass
    return min(48 * 1024 * 1024, int(cap * 0.6))


# ---------------------------------------------------------------------------
# Wrapper: one attention layer on channel-major maps x1, x2 of shape (b, C, n).
# queries/keys come from x1, values from x2 (matches sa(seq1, seq1, seq2)).
# ---------------------------------------------------------------------------
def sa_attention_nchw(prepared, x1, x2, *, h, d_k, d_v):
    b, d_model, n = x1.shape
    tq = _pick_seq_tile(n)
    tk = tq
    grid = (b, n // tq, n // tk)

    kern = functools.partial(_sa_flash_kernel, h=h, d_k=d_k, d_v=d_v)

    def _full(arr):
        shp = tuple(arr.shape)
        return pl.BlockSpec(shp, lambda bi, qi, ki, _s=shp: (0,) * len(_s))

    return pl.pallas_call(
        kern,
        out_shape=jax.ShapeDtypeStruct((b, d_model, n), x1.dtype),
        grid_spec=pltpu.PrefetchScalarGridSpec(
            num_scalar_prefetch=0,
            grid=grid,
            in_specs=[
                # query-source tile (does not move along the kv axis)
                pl.BlockSpec((None, d_model, tq), lambda bi, qi, ki: (bi, 0, qi)),
                # key-source tile
                pl.BlockSpec((None, d_model, tk), lambda bi, qi, ki: (bi, 0, ki)),
                # value-source tile
                pl.BlockSpec((None, d_model, tk), lambda bi, qi, ki: (bi, 0, ki)),
                _full(prepared["wq"]), _full(prepared["bq"]),
                _full(prepared["wk"]), _full(prepared["bk"]),
                _full(prepared["wv"]), _full(prepared["bv"]),
                _full(prepared["wo"]), _full(prepared["bo"]),
            ],
            out_specs=pl.BlockSpec((None, d_model, tq),
                                   lambda bi, qi, ki: (bi, 0, qi)),
            scratch_shapes=[
                pltpu.VMEM((h, 1, tq), jnp.float32),    # running max m
                pltpu.VMEM((h, 1, tq), jnp.float32),    # running sum l
                pltpu.VMEM((h, d_v, tq), jnp.float32),  # output accumulator
            ],
        ),
        compiler_params=pltpu.CompilerParams(
            dimension_semantics=("parallel", "parallel", "arbitrary"),
            vmem_limit_bytes=_vmem_limit_bytes()),
    )(x1, x1, x2,
      prepared["wq"], prepared["bq"], prepared["wk"], prepared["bk"],
      prepared["wv"], prepared["bv"], prepared["wo"], prepared["bo"])


# ---------------------------------------------------------------------------
# Parameters: PyTorch-layout init (normal(std=1e-3) weights, zero bias) and a
# one-time kernel-side prep (hoisted out of the forward pass).
# ---------------------------------------------------------------------------
def init_sa_params(key, d_model, d_k, d_v, h, dtype=jnp.float32):
    kq, kk, kv, ko = jax.random.split(key, 4)
    std = 1e-3
    return {
        "wq": jax.random.normal(kq, (h * d_k, d_model), dtype) * std,
        "bq": jnp.zeros((h * d_k,), dtype),
        "wk": jax.random.normal(kk, (h * d_k, d_model), dtype) * std,
        "bk": jnp.zeros((h * d_k,), dtype),
        "wv": jax.random.normal(kv, (h * d_v, d_model), dtype) * std,
        "bv": jnp.zeros((h * d_v,), dtype),
        "wo": jax.random.normal(ko, (d_model, h * d_v), dtype) * std,
        "bo": jnp.zeros((d_model,), dtype),
    }


def prepare_sa_params(raw, d_k):
    """Fold 1/sqrt(d_k) into Q, cast matmul weights to bf16, make biases
    (out, 1) columns for the channel-major layout. Call once, reuse."""
    scale = 1.0 / math.sqrt(d_k)
    bf = lambda w: w.astype(jnp.bfloat16)
    col = lambda v: v.reshape(-1, 1).astype(jnp.float32)
    return {
        "wq": bf(raw["wq"] * scale), "bq": col(raw["bq"] * scale),
        "wk": bf(raw["wk"]), "bk": col(raw["bk"]),
        "wv": bf(raw["wv"]), "bv": col(raw["bv"]),
        "wo": bf(raw["wo"]), "bo": col(raw["bo"]),
    }


# ---------------------------------------------------------------------------
# SA_after_FPN forward: one SA layer per FPN level. Only free reshapes around
# the kernel — no HBM transposes.
# ---------------------------------------------------------------------------
def sa_after_fpn_forward(prepared_list, fpn_features1, fpn_features2,
                         *, h_heads=1, d_k=64, d_v=64):
    outs = list(fpn_features1)
    for idx, (f1, f2, p) in enumerate(zip(fpn_features1, fpn_features2,
                                          prepared_list)):
        b, c, hh, ww = f1.shape
        x1 = f1.reshape(b, c, hh * ww)     # free reshape (NCHW contiguous)
        x2 = f2.reshape(b, c, hh * ww)
        y = sa_attention_nchw(p, x1, x2, h=h_heads, d_k=d_k, d_v=d_v)
        outs[idx] = y.reshape(b, c, hh, ww)
    return outs


# ---------------------------------------------------------------------------
# Pure-JAX f32 reference (mirrors the PyTorch module) + checker.
# ---------------------------------------------------------------------------
def _sa_ref(raw, seq1, seq2, *, h, d_k, d_v):
    b, n, d_model = seq1.shape
    q = seq1 @ raw["wq"].T + raw["bq"]
    k = seq1 @ raw["wk"].T + raw["bk"]
    v = seq2 @ raw["wv"].T + raw["bv"]
    q = q.reshape(b, n, h, d_k).transpose(0, 2, 1, 3)
    k = k.reshape(b, n, h, d_k).transpose(0, 2, 3, 1)
    v = v.reshape(b, n, h, d_v).transpose(0, 2, 1, 3)
    att = jnp.matmul(q, k) / np.sqrt(d_k)
    att = jax.nn.softmax(att, axis=-1)
    out = jnp.matmul(att, v).transpose(0, 2, 1, 3).reshape(b, n, h * d_v)
    return out @ raw["wo"].T + raw["bo"]


def _check(raw_list, fpn1, fpn2, outs, h_heads, d_k, d_v, rtol, atol):
    for f1, f2, p, o in zip(fpn1, fpn2, raw_list, outs):
        bb, cc, hh, ww = f1.shape
        s1 = f1.reshape(bb, cc, hh * ww).transpose(0, 2, 1)
        s2 = f2.reshape(bb, cc, hh * ww).transpose(0, 2, 1)
        ref = _sa_ref(p, s1, s2, h=h_heads, d_k=d_k, d_v=d_v)
        ref = ref.transpose(0, 2, 1).reshape(bb, cc, hh, ww)
        np.testing.assert_allclose(np.asarray(o), np.asarray(ref),
                                   rtol=rtol, atol=atol)


if __name__ == "__main__":
    key = jax.random.PRNGKey(0)

    # Small config: two FPN levels, 32 channels, batch=2, 8x8 spatial (n=64).
    fpn_out_channels = (32, 32)
    b, spatial = 2, 8
    h_heads, d_k, d_v = 1, 64, 64

    k_feat, k_par = jax.random.split(key)
    feat_keys = jax.random.split(k_feat, 2 * len(fpn_out_channels))
    par_keys = jax.random.split(k_par, len(fpn_out_channels))

    fpn1 = [jax.random.normal(feat_keys[2 * i], (b, c, spatial, spatial),
                              jnp.float32)
            for i, c in enumerate(fpn_out_channels)]
    fpn2 = [jax.random.normal(feat_keys[2 * i + 1], (b, c, spatial, spatial),
                              jnp.float32)
            for i, c in enumerate(fpn_out_channels)]

    raw_list = [init_sa_params(par_keys[i], c, d_k, d_v, h_heads)
                for i, c in enumerate(fpn_out_channels)]
    prepared_list = [prepare_sa_params(p, d_k) for p in raw_list]

    # 1) Module-faithful init (std=1e-3 weights, zero bias).
    outs = sa_after_fpn_forward(prepared_list, fpn1, fpn2,
                                h_heads=h_heads, d_k=d_k, d_v=d_v)
    outs = [jax.block_until_ready(o) for o in outs]
    _check(raw_list, fpn1, fpn2, outs, h_heads, d_k, d_v,
           rtol=2e-2, atol=1e-6)

    # 2) Stress check: larger weights exercise the online softmax at realistic
    #    logit magnitudes; tolerance absorbs bf16 matmuls + approx reciprocal.
    big_raw = [jax.tree_util.tree_map(lambda w: w * 200.0, p) for p in raw_list]
    big_prepared = [prepare_sa_params(p, d_k) for p in big_raw]
    outs_big = sa_after_fpn_forward(big_prepared, fpn1, fpn2,
                                    h_heads=h_heads, d_k=d_k, d_v=d_v)
    outs_big = [jax.block_until_ready(o) for o in outs_big]
    _check(big_raw, fpn1, fpn2, outs_big, h_heads, d_k, d_v,
           rtol=1e-1, atol=2e-2)

    print("KERNEL_OK")
</pallas_src>

<mosaic_0001>
module attributes {stable_mosaic.version = 11 : i64} {
  func.func @_sa_flash_kernel(%arg0: i32, %arg1: i32, %arg2: i32, %arg3: memref<1x32x64xf32, #tpu.memory_space<vmem>>, %arg4: memref<1x32x64xf32, #tpu.memory_space<vmem>>, %arg5: memref<1x32x64xf32, #tpu.memory_space<vmem>>, %arg6: memref<64x32xbf16, #tpu.memory_space<vmem>>, %arg7: memref<64x1xf32, #tpu.memory_space<vmem>>, %arg8: memref<64x32xbf16, #tpu.memory_space<vmem>>, %arg9: memref<64x1xf32, #tpu.memory_space<vmem>>, %arg10: memref<64x32xbf16, #tpu.memory_space<vmem>>, %arg11: memref<64x1xf32, #tpu.memory_space<vmem>>, %arg12: memref<32x64xbf16, #tpu.memory_space<vmem>>, %arg13: memref<32x1xf32, #tpu.memory_space<vmem>>, %arg14: memref<1x32x64xf32, #tpu.memory_space<vmem>>, %arg15: memref<1x1x64xf32, #tpu.memory_space<vmem>>, %arg16: memref<1x1x64xf32, #tpu.memory_space<vmem>>, %arg17: memref<1x64x64xf32, #tpu.memory_space<vmem>>) attributes {dimension_semantics = [#tpu.dimension_semantics<parallel>, #tpu.dimension_semantics<parallel>, #tpu.dimension_semantics<arbitrary>], iteration_bounds = array<i64: 2, 1, 1>, scalar_prefetch = 0 : i64, scratch_operands = 3 : i64, tpu.core_type = #tpu.core_type<tc>, window_params = [{transform_indices = @transform_0, window_bounds = array<i64: 1, 32, 64>}, {transform_indices = @transform_1, window_bounds = array<i64: 1, 32, 64>}, {transform_indices = @transform_2, window_bounds = array<i64: 1, 32, 64>}, {pipeline_mode = #tpu.pipeline_mode<synchronous>, transform_indices = @transform_3, window_bounds = array<i64: 64, 32>}, {pipeline_mode = #tpu.pipeline_mode<synchronous>, transform_indices = @transform_4, window_bounds = array<i64: 64, 1>}, {pipeline_mode = #tpu.pipeline_mode<synchronous>, transform_indices = @transform_5, window_bounds = array<i64: 64, 32>}, {pipeline_mode = #tpu.pipeline_mode<synchronous>, transform_indices = @transform_6, window_bounds = array<i64: 64, 1>}, {pipeline_mode = #tpu.pipeline_mode<synchronous>, transform_indices = @transform_7, window_bounds = array<i64: 64, 32>}, {pipeline_mode = #tpu.pipeline_mode<synchronous>, transform_indices = @transform_8, window_bounds = array<i64: 64, 1>}, {pipeline_mode = #tpu.pipeline_mode<synchronous>, transform_indices = @transform_9, window_bounds = array<i64: 32, 64>}, {pipeline_mode = #tpu.pipeline_mode<synchronous>, transform_indices = @transform_10, window_bounds = array<i64: 32, 1>}, {transform_indices = @transform_11, window_bounds = array<i64: 1, 32, 64>}]} {
    %c0_i32 = arith.constant 0 : i32
    %0 = arith.cmpi eq, %arg2, %c0_i32 : i32
    %1 = arith.extui %0 : i1 to i32
    %c0_i32_0 = arith.constant 0 : i32
    %2 = arith.cmpi ne, %1, %c0_i32_0 : i32
    scf.if %2 {
      %cst_47 = arith.constant 0xFF800000 : f32
      %60 = vector.broadcast %cst_47 : f32 to vector<1x1x64xf32>
      %c0_48 = arith.constant 0 : index
      %c0_49 = arith.constant 0 : index
      %c0_50 = arith.constant 0 : index
      %61 = vector.load %arg15[%c0_48, %c0_49, %c0_50] : memref<1x1x64xf32, #tpu.memory_space<vmem>>, vector<1x1x64xf32>
      tpu.vector_store %arg15[%c0_48, %c0_49, %c0_50], %60 {strides = array<i32>} : memref<1x1x64xf32, #tpu.memory_space<vmem>>, vector<1x1x64xf32>,
      %cst_51 = arith.constant 0.000000e+00 : f32
      %62 = vector.broadcast %cst_51 : f32 to vector<1x1x64xf32>
      %c0_52 = arith.constant 0 : index
      %c0_53 = arith.constant 0 : index
      %c0_54 = arith.constant 0 : index
      %63 = vector.load %arg16[%c0_52, %c0_53, %c0_54] : memref<1x1x64xf32, #tpu.memory_space<vmem>>, vector<1x1x64xf32>
      tpu.vector_store %arg16[%c0_52, %c0_53, %c0_54], %62 {strides = array<i32>} : memref<1x1x64xf32, #tpu.memory_space<vmem>>, vector<1x1x64xf32>,
      %cst_55 = arith.constant 0.000000e+00 : f32
      %64 = vector.broadcast %cst_55 : f32 to vector<1x64x64xf32>
      %c0_56 = arith.constant 0 : index
      %c0_57 = arith.constant 0 : index
      %c0_58 = arith.constant 0 : index
      %65 = vector.load %arg17[%c0_56, %c0_57, %c0_58] : memref<1x64x64xf32, #tpu.memory_space<vmem>>, vector<1x64x64xf32>
      tpu.vector_store %arg17[%c0_56, %c0_57, %c0_58], %64 {strides = array<i32>} : memref<1x64x64xf32, #tpu.memory_space<vmem>>, vector<1x64x64xf32>,
    } else {
    }
    %c0 = arith.constant 0 : index
    %c0_1 = arith.constant 0 : index
    %c0_2 = arith.constant 0 : index
    %3 = vector.load %arg3[%c0, %c0_1, %c0_2] : memref<1x32x64xf32, #tpu.memory_space<vmem>>, vector<1x32x64xf32>
    %4 = vector.shape_cast %3 : vector<1x32x64xf32> to vector<32x64xf32>
    %5 = arith.truncf %4 : vector<32x64xf32> to vector<32x64xbf16>
    %c0_3 = arith.constant 0 : index
    %c0_4 = arith.constant 0 : index
    %c0_5 = arith.constant 0 : index
    %6 = vector.load %arg4[%c0_3, %c0_4, %c0_5] : memref<1x32x64xf32, #tpu.memory_space<vmem>>, vector<1x32x64xf32>
    %7 = vector.shape_cast %6 : vector<1x32x64xf32> to vector<32x64xf32>
    %8 = arith.truncf %7 : vector<32x64xf32> to vector<32x64xbf16>
    %c0_6 = arith.constant 0 : index
    %c0_7 = arith.constant 0 : index
    %c0_8 = arith.constant 0 : index
    %9 = vector.load %arg5[%c0_6, %c0_7, %c0_8] : memref<1x32x64xf32, #tpu.memory_space<vmem>>, vector<1x32x64xf32>
    %10 = vector.shape_cast %9 : vector<1x32x64xf32> to vector<32x64xf32>
    %11 = arith.truncf %10 : vector<32x64xf32> to vector<32x64xbf16>
    %c0_9 = arith.constant 0 : index
    %c0_10 = arith.constant 0 : index
    %12 = vector.load %arg6[%c0_9, %c0_10] : memref<64x32xbf16, #tpu.memory_space<vmem>>, vector<64x32xbf16>
    %cst = arith.constant dense<0.000000e+00> : vector<64x64xf32>
    %13 = tpu.matmul %12, %5, %cst {dimension_numbers = #tpu.dot_dimension_numbers<[1], [0], [0], [1], [0, 0, 1, 1], [], []>} : vector<64x32xbf16>, vector<32x64xbf16>, vector<64x64xf32> -> vector<64x64xf32>
    %c0_11 = arith.constant 0 : index
    %c0_12 = arith.constant 0 : index
    %14 = vector.load %arg7[%c0_11, %c0_12] : memref<64x1xf32, #tpu.memory_space<vmem>>, vector<64x1xf32>
    %15 = vector.broadcast %14 : vector<64x1xf32> to vector<64x64xf32>
    %16 = arith.addf %13, %15 : vector<64x64xf32>
    %17 = vector.shape_cast %16 : vector<64x64xf32> to vector<1x64x64xf32>
    %18 = arith.truncf %17 : vector<1x64x64xf32> to vector<1x64x64xbf16>
    %c0_13 = arith.constant 0 : index
    %c0_14 = arith.constant 0 : index
    %19 = vector.load %arg8[%c0_13, %c0_14] : memref<64x32xbf16, #tpu.memory_space<vmem>>, vector<64x32xbf16>
    %cst_15 = arith.constant dense<0.000000e+00> : vector<64x64xf32>
    %20 = tpu.matmul %19, %8, %cst_15 {dimension_numbers = #tpu.dot_dimension_numbers<[1], [0], [0], [1], [0, 0, 1, 1], [], []>} : vector<64x32xbf16>, vector<32x64xbf16>, vector<64x64xf32> -> vector<64x64xf32>
    %c0_16 = arith.constant 0 : index
    %c0_17 = arith.constant 0 : index
    %21 = vector.load %arg9[%c0_16, %c0_17] : memref<64x1xf32, #tpu.memory_space<vmem>>, vector<64x1xf32>
    %22 = vector.broadcast %21 : vector<64x1xf32> to vector<64x64xf32>
    %23 = arith.addf %20, %22 : vector<64x64xf32>
    %24 = vector.shape_cast %23 : vector<64x64xf32> to vector<1x64x64xf32>
    %25 = arith.truncf %24 : vector<1x64x64xf32> to vector<1x64x64xbf16>
    %c0_18 = arith.constant 0 : index
    %c0_19 = arith.constant 0 : index
    %26 = vector.load %arg10[%c0_18, %c0_19] : memref<64x32xbf16, #tpu.memory_space<vmem>>, vector<64x32xbf16>
    %cst_20 = arith.constant dense<0.000000e+00> : vector<64x64xf32>
    %27 = tpu.matmul %26, %11, %cst_20 {dimension_numbers = #tpu.dot_dimension_numbers<[1], [0], [0], [1], [0, 0, 1, 1], [], []>} : vector<64x32xbf16>, vector<32x64xbf16>, vector<64x64xf32> -> vector<64x64xf32>
    %c0_21 = arith.constant 0 : index
    %c0_22 = arith.constant 0 : index
    %28 = vector.load %arg11[%c0_21, %c0_22] : memref<64x1xf32, #tpu.memory_space<vmem>>, vector<64x1xf32>
    %29 = vector.broadcast %28 : vector<64x1xf32> to vector<64x64xf32>
    %30 = arith.addf %27, %29 : vector<64x64xf32>
    %31 = vector.shape_cast %30 : vector<64x64xf32> to vector<1x64x64xf32>
    %32 = arith.truncf %31 : vector<1x64x64xf32> to vector<1x64x64xbf16>
    %cst_23 = arith.constant dense<0.000000e+00> : vector<1x64x64xf32>
    %33 = tpu.matmul %25, %18, %cst_23 {dimension_numbers = #tpu.dot_dimension_numbers<[1], [1], [2], [2], [0, 0, 0, 2, 1, 2], [0], [0]>} : vector<1x64x64xbf16>, vector<1x64x64xbf16>, vector<1x64x64xf32> -> vector<1x64x64xf32>
    %c0_24 = arith.constant 0 : index
    %c0_25 = arith.constant 0 : index
    %c0_26 = arith.constant 0 : index
    %34 = vector.load %arg15[%c0_24, %c0_25, %c0_26] : memref<1x1x64xf32, #tpu.memory_space<vmem>>, vector<1x1x64xf32>
    %cst_27 = arith.constant dense<0xFF800000> : vector<1x64xf32>
    %35 = vector.multi_reduction <maximumf>, %33, %cst_27 [1] : vector<1x64x64xf32> to vector<1x64xf32>
    %36 = vector.shape_cast %35 : vector<1x64xf32> to vector<1x1x64xf32>
    %37 = arith.maximumf %34, %36 : vector<1x1x64xf32>
    %38 = arith.subf %34, %37 : vector<1x1x64xf32>
    %39 = math.exp %38 : vector<1x1x64xf32>
    %40 = vector.broadcast %37 : vector<1x1x64xf32> to vector<1x64x64xf32>
    %41 = arith.subf %33, %40 : vector<1x64x64xf32>
    %42 = math.exp %41 : vector<1x64x64xf32>
    %c0_28 = arith.constant 0 : index
    %c0_29 = arith.constant 0 : index
    %c0_30 = arith.constant 0 : index
    %43 = vector.load %arg16[%c0_28, %c0_29, %c0_30] : memref<1x1x64xf32, #tpu.memory_space<vmem>>, vector<1x1x64xf32>
    %44 = arith.mulf %39, %43 : vector<1x1x64xf32>
    %cst_31 = arith.constant dense<0.000000e+00> : vector<1x64xf32>
    %45 = vector.multi_reduction <add>, %42, %cst_31 [1] : vector<1x64x64xf32> to vector<1x64xf32>
    %46 = vector.shape_cast %45 : vector<1x64xf32> to vector<1x1x64xf32>
    %47 = arith.addf %44, %46 : vector<1x1x64xf32>
    %c0_32 = arith.constant 0 : index
    %c0_33 = arith.constant 0 : index
    %c0_34 = arith.constant 0 : index
    %48 = vector.load %arg16[%c0_32, %c0_33, %c0_34] : memref<1x1x64xf32, #tpu.memory_space<vmem>>, vector<1x1x64xf32>
    tpu.vector_store %arg16[%c0_32, %c0_33, %c0_34], %47 {strides = array<i32>} : memref<1x1x64xf32, #tpu.memory_space<vmem>>, vector<1x1x64xf32>,
    %c0_35 = arith.constant 0 : index
    %c0_36 = arith.constant 0 : index
    %c0_37 = arith.constant 0 : index
    %49 = vector.load %arg17[%c0_35, %c0_36, %c0_37] : memref<1x64x64xf32, #tpu.memory_space<vmem>>, vector<1x64x64xf32>
    %50 = vector.broadcast %39 : vector<1x1x64xf32> to vector<1x64x64xf32>
    %51 = arith.mulf %50, %49 : vector<1x64x64xf32>
    %52 = arith.truncf %42 : vector<1x64x64xf32> to vector<1x64x64xbf16>
    %cst_38 = arith.constant dense<0.000000e+00> : vector<1x64x64xf32>
    %53 = tpu.matmul %32, %52, %cst_38 {dimension_numbers = #tpu.dot_dimension_numbers<[2], [1], [1], [2], [0, 0, 0, 1, 1, 2], [0], [0]>} : vector<1x64x64xbf16>, vector<1x64x64xbf16>, vector<1x64x64xf32> -> vector<1x64x64xf32>
    %54 = arith.addf %51, %53 : vector<1x64x64xf32>
    %c0_39 = arith.constant 0 : index
    %c0_40 = arith.constant 0 : index
    %c0_41 = arith.constant 0 : index
    %55 = vector.load %arg17[%c0_39, %c0_40, %c0_41] : memref<1x64x64xf32, #tpu.memory_space<vmem>>, vector<1x64x64xf32>
    tpu.vector_store %arg17[%c0_39, %c0_40, %c0_41], %54 {strides = array<i32>} : memref<1x64x64xf32, #tpu.memory_space<vmem>>, vector<1x64x64xf32>,
    %c0_42 = arith.constant 0 : index
    %c0_43 = arith.constant 0 : index
    %c0_44 = arith.constant 0 : index
    %56 = vector.load %arg15[%c0_42, %c0_43, %c0_44] : memref<1x1x64xf32, #tpu.memory_space<vmem>>, vector<1x1x64xf32>
    tpu.vector_store %arg15[%c0_42, %c0_43, %c0_44], %37 {strides = array<i32>} : memref<1x1x64xf32, #tpu.memory_space<vmem>>, vector<1x1x64xf32>,
    %c0_i32_45 = arith.constant 0 : i32
    %57 = arith.cmpi eq, %arg2, %c0_i32_45 : i32
    %58 = arith.extui %57 : i1 to i32
    %c0_i32_46 = arith.constant 0 : i32
    %59 = arith.cmpi ne, %58, %c0_i32_46 : i32
    scf.if %59 {
      %c0_47 = arith.constant 0 : index
      %c0_48 = arith.constant 0 : index
      %c0_49 = arith.constant 0 : index
      %60 = vector.load %arg17[%c0_47, %c0_48, %c0_49] : memref<1x64x64xf32, #tpu.memory_space<vmem>>, vector<1x64x64xf32>
      %c0_50 = arith.constant 0 : index
      %c0_51 = arith.constant 0 : index
      %c0_52 = arith.constant 0 : index
      %61 = vector.load %arg16[%c0_50, %c0_51, %c0_52] : memref<1x1x64xf32, #tpu.memory_space<vmem>>, vector<1x1x64xf32>
      %62 = tpu.reciprocal %61 {approx = true} : vector<1x1x64xf32> -> vector<1x1x64xf32>
      %63 = vector.broadcast %62 : vector<1x1x64xf32> to vector<1x64x64xf32>
      %64 = arith.mulf %60, %63 : vector<1x64x64xf32>
      %65 = vector.shape_cast %64 : vector<1x64x64xf32> to vector<64x64xf32>
      %66 = arith.truncf %65 : vector<64x64xf32> to vector<64x64xbf16>
      %c0_53 = arith.constant 0 : index
      %c0_54 = arith.constant 0 : index
      %67 = vector.load %arg12[%c0_53, %c0_54] : memref<32x64xbf16, #tpu.memory_space<vmem>>, vector<32x64xbf16>
      %cst_55 = arith.constant dense<0.000000e+00> : vector<32x64xf32>
      %68 = tpu.matmul %67, %66, %cst_55 {dimension_numbers = #tpu.dot_dimension_numbers<[1], [0], [0], [1], [0, 0, 1, 1], [], []>} : vector<32x64xbf16>, vector<64x64xbf16>, vector<32x64xf32> -> vector<32x64xf32>
      %c0_56 = arith.constant 0 : index
      %c0_57 = arith.constant 0 : index
      %69 = vector.load %arg13[%c0_56, %c0_57] : memref<32x1xf32, #tpu.memory_space<vmem>>, vector<32x1xf32>
      %70 = vector.broadcast %69 : vector<32x1xf32> to vector<32x64xf32>
      %71 = arith.addf %68, %70 : vector<32x64xf32>
      %c0_58 = arith.constant 0 : index
      %c0_59 = arith.constant 0 : index
      %c0_60 = arith.constant 0 : index
      %72 = vector.load %arg14[%c0_58, %c0_59, %c0_60] : memref<1x32x64xf32, #tpu.memory_space<vmem>>, vector<1x32x64xf32>
      %73 = vector.shape_cast %72 : vector<1x32x64xf32> to vector<32x64xf32>
      %74 = vector.shape_cast %71 : vector<32x64xf32> to vector<1x32x64xf32>
      tpu.vector_store %arg14[%c0_58, %c0_59, %c0_60], %74 {strides = array<i32>} : memref<1x32x64xf32, #tpu.memory_space<vmem>>, vector<1x32x64xf32>,
    } else {
    }
    return
  }
  func.func @transform_0(%arg0: i32, %arg1: i32, %arg2: i32) -> (i32, i32, i32) {
    %c0_i32 = arith.constant 0 : i32
    %c0_i32_0 = arith.constant 0 : i32
    return %arg0, %c0_i32, %arg1 : i32, i32, i32
  }
  func.func @transform_1(%arg0: i32, %arg1: i32, %arg2: i32) -> (i32, i32, i32) {
    %c0_i32 = arith.constant 0 : i32
    %c0_i32_0 = arith.constant 0 : i32
    return %arg0, %c0_i32, %arg2 : i32, i32, i32
  }
  func.func @transform_2(%arg0: i32, %arg1: i32, %arg2: i32) -> (i32, i32, i32) {
    %c0_i32 = arith.constant 0 : i32
    %c0_i32_0 = arith.constant 0 : i32
    return %arg0, %c0_i32, %arg2 : i32, i32, i32
  }
  func.func @transform_3(%arg0: i32, %arg1: i32, %arg2: i32) -> (i32, i32) {
    %c0_i32 = arith.constant 0 : i32
    %c0_i32_0 = arith.constant 0 : i32
    %c0_i32_1 = arith.constant 0 : i32
    return %c0_i32, %c0_i32_0 : i32, i32
  }
  func.func @transform_4(%arg0: i32, %arg1: i32, %arg2: i32) -> (i32, i32) {
    %c0_i32 = arith.constant 0 : i32
    %c0_i32_0 = arith.constant 0 : i32
    %c0_i32_1 = arith.constant 0 : i32
    return %c0_i32, %c0_i32_0 : i32, i32
  }
  func.func @transform_5(%arg0: i32, %arg1: i32, %arg2: i32) -> (i32, i32) {
    %c0_i32 = arith.constant 0 : i32
    %c0_i32_0 = arith.constant 0 : i32
    %c0_i32_1 = arith.constant 0 : i32
    return %c0_i32, %c0_i32_0 : i32, i32
  }
  func.func @transform_6(%arg0: i32, %arg1: i32, %arg2: i32) -> (i32, i32) {
    %c0_i32 = arith.constant 0 : i32
    %c0_i32_0 = arith.constant 0 : i32
    %c0_i32_1 = arith.constant 0 : i32
    return %c0_i32, %c0_i32_0 : i32, i32
  }
  func.func @transform_7(%arg0: i32, %arg1: i32, %arg2: i32) -> (i32, i32) {
    %c0_i32 = arith.constant 0 : i32
    %c0_i32_0 = arith.constant 0 : i32
    %c0_i32_1 = arith.constant 0 : i32
    return %c0_i32, %c0_i32_0 : i32, i32
  }
  func.func @transform_8(%arg0: i32, %arg1: i32, %arg2: i32) -> (i32, i32) {
    %c0_i32 = arith.constant 0 : i32
    %c0_i32_0 = arith.constant 0 : i32
    %c0_i32_1 = arith.constant 0 : i32
    return %c0_i32, %c0_i32_0 : i32, i32
  }
  func.func @transform_9(%arg0: i32, %arg1: i32, %arg2: i32) -> (i32, i32) {
    %c0_i32 = arith.constant 0 : i32
    %c0_i32_0 = arith.constant 0 : i32
    %c0_i32_1 = arith.constant 0 : i32
    return %c0_i32, %c0_i32_0 : i32, i32
  }
  func.func @transform_10(%arg0: i32, %arg1: i32, %arg2: i32) -> (i32, i32) {
    %c0_i32 = arith.constant 0 : i32
    %c0_i32_0 = arith.constant 0 : i32
    %c0_i32_1 = arith.constant 0 : i32
    return %c0_i32, %c0_i32_0 : i32, i32
  }
  func.func @transform_11(%arg0: i32, %arg1: i32, %arg2: i32) -> (i32, i32, i32) {
    %c0_i32 = arith.constant 0 : i32
    %c0_i32_0 = arith.constant 0 : i32
    return %arg0, %c0_i32, %arg1 : i32, i32, i32
  }
}

</mosaic_0001>

<bundles_post_ra>
// kernel: tpu_custom_call.1
= control target key start
LH: loop header
LB: loop body
LE: loop exit
PB: predicated region body
PF: predicated region fallthrough
CT: control target
= control target key end

     0   :  { %s2308_s0 = inlined_call_operand.vmem [shape: f32[2,32,64], index: 0, kind: input, shape index: {}]   ;;  %s2309_s1 = inlined_call_operand.vmem [shape: f32[2,32,64], index: 1, kind: input, shape index: {}]   ;;  %s2310_s2 = inlined_call_operand.vmem [shape: f32[2,32,64], index: 2, kind: input, shape index: {}]   ;;  %s2311_s3 = inlined_call_operand.vmem [shape: bf16[64,32], index: 3, kind: input, shape index: {}]   ;;  %s2312_s4 = inlined_call_operand.vmem [shape: f32[64,1], index: 4, kind: input, shape index: {}]   ;;  %s2313_s5 = inlined_call_operand.vmem [shape: bf16[64,32], index: 5, kind: input, shape index: {}]   ;;  %s2314_s6 = inlined_call_operand.vmem [shape: f32[64,1], index: 6, kind: input, shape index: {}]   ;;  %s2315_s7 = inlined_call_operand.vmem [shape: bf16[64,32], index: 7, kind: input, shape index: {}]   ;;  %s2316_s8 = inlined_call_operand.vmem [shape: f32[64,1], index: 8, kind: input, shape index: {}]   ;;  %s2317_s9 = inlined_call_operand.vmem [shape: bf16[32,64], index: 9, kind: input, shape index: {}]   ;;  %s2318_s10 = inlined_call_operand.vmem [shape: f32[32,1], index: 10, kind: input, shape index: {}]   ;;  %s2319_s11 = inlined_call_operand.hbm [shape: f32[2,32,64], index: 11, kind: output, shape index: {}]  }
   0x1   :  { %2321 = sst [smem:[#allocation9_spill]] %s2308_s0 }
   0x2   :  { %16 = vsyncpa [#allocation6], 0 }
   0x3   :  { %18 = vsyncpa [#allocation6 + $0x1], 0  ;;  %s1961_s17 = smov 0   ;;  %s1963_s18 = smov 0  }
   0x4   :  { %s1965_s19 = smov 0   ;;  %s1967_s20 = smov 0  }
   0x5   :  { %s1969_s21 = smov 0   ;;  %s1971_s22 = smov 0  }
   0x6 LB: > { %s1542_s23 = sadd.s32 4294967295, %s1893_s22   ;;  %s1543_s24 = sadd.s32 4294967294, %s1893_s22   ;;  %s1893_s22 = sphi %s1971_s22, %s24_s22   ;;  %s1889_s21 = sphi %s1969_s21, %s2331_s21   ;;  %s1885_s20 = sphi %s1967_s20, %s2330_s20   ;;  %s1881_s19 = sphi %s1965_s19, %s2329_s19   ;;  %s1877_s18 = sphi %s1963_s18, %s2328_s18   ;;  %s1873_s17 = sphi %s1961_s17, %s2327_s17  }
   0x7   : > { %s43_s25 = sadd.s32 1, %s1889_s21  ;;  %s304_s26 = sadd.s32 1, %s1881_s19 }
   0x8   : > { %p45_p0 = scmp.ge.s32.totalorder %s43_s25, 2  ;;  %p314_p1 = scmp.ne.s32.totalorder %s1881_s19, %s1877_s18 }
   0x9   : > { %p315_p2 = scmp.eq.s32.totalorder %s1542_s23, 1  ;;  %p320_p3 = scmp.ne.s32.totalorder %s1877_s18, %s1873_s17 }
   0xa   : > { %s2333_s25 = smov (%p45_p0, %s43_s25), 0  ;;  %p321_p5 = scmp.eq.s32.totalorder %s1543_s24, 1 }
   0xb   : > { %2322 = sst [smem:[#allocation8_spill]] %s2333_s25  ;;  %p2001_p4 = por %p315_p2, %p314_p1 }
   0xc   : > { %s299_s28 = ssub.s32 %s1889_s21, %s2333_s25  ;;  %p1546_p6 = scmp.ge.s32.totalorder %s1893_s22, 1 }
   0xd   : > { %p302_p7 = scmp.eq.s32.totalorder %s299_s28, 0  ;;  %p2008_p8 = por %p321_p5, %p320_p3 }
   0xe   : > { %p396_p9 = scmp.lt.s32.totalorder %s1893_s22, 3 }
   0xf   : > { %s2014_s30 = scalar_select %p302_p7, %s1881_s19, %s304_s26  }
  0x10   : > { %p397_p10 = pnand %p1546_p6, %p396_p9 }
  0x11   : > { %p455_p11 = scmp.lt.s32.totalorder (!%p397_p10), %s1885_s20, 1  ;;  %v1781_v0 = vld [vmem:[%s2311_s3] sm:$0xff] (!%p397_p10)   ;;  %vm590_vm0 = vcmask (!%p397_p10), 261120   ;;  %v1895_v2 = vmov (!%p397_p10), 0   ;;  %s2325_s0 = sld [smem:[#allocation9_spill]] (!%p397_p10)  ;;  %v1783_v16 = vld [vmem:[%s2311_s3 + $0x8] sm:$0xff] (!%p397_p10)  }
  0x12   : > { %400 = sbr.rel (%p397_p10) target bundleno = 1124 (0x464), region = 64  ;;  %v1782_v1 = vld [vmem:[%s2313_s5] sm:$0xff] (!%p397_p10)   ;;  %1643 = vmatprep.mubr.msk.bf16.mxu0 (!%p397_p10), %vm590_vm0, %v1781_v0  ;;  %1780 = vset.pattern.permute.xlu1 (!%p397_p10), %v1895_v2  ;;  %v682_v20 = vld [vmem:[%s2314_s6 + $0x10] sm:$0xff] (!%p397_p10)  ;;  %v1784_v22 = vld [vmem:[%s2313_s5 + $0x8] sm:$0xff] (!%p397_p10)   ;;  %vm487_vm1 = vcmask (!%p397_p10), 523264   ;;  %vm484_vm2 = vcmask (!%p397_p10), 516096  }
  0x13   : > { %1655 = vmatprep.mubr.msk.bf16.mxu1 (!%p397_p10), %vm590_vm0, %v1782_v1  ;;  %1779 = vset.pattern.permute.xlu0 (!%p397_p10), %v1895_v2  ;;  %v1785_v23 = vld [vmem:[%s2311_s3 + $0x10] sm:$0xff] (!%p397_p10)   ;;  %v683_v24 = vld [vmem:[%s2314_s6 + $0x18] sm:$0xff] (!%p397_p10)  ;;  %v685_v27 = vld [vmem:[%s2314_s6 + $0x28] sm:$0xff] (!%p397_p10)  ;;  %s1598_s13 = sshll.u32 (!%p397_p10), %s1885_s20, 9 }
  0x14   : > { %700 = vperm.xlu1 (!%p397_p10), %1780, %v682_v20   ;;  %v1786_v25 = vld [vmem:[%s2313_s5 + $0x10] sm:$0xff] (!%p397_p10)   ;;  %v680_v28 = vld [vmem:[%s2314_s6] sm:$0xff] (!%p397_p10)  ;;  %v1787_v29 = vld [vmem:[%s2311_s3 + $0x18] sm:$0xff] (!%p397_p10)  }
  0x15   : > { %690 = vperm.xlu0 (!%p397_p10), %1779, %v680_v28   ;;  %v681_v30 = vld [vmem:[%s2314_s6 + $0x8] sm:$0xff] (!%p397_p10)  ;;  %v1788_v31 = vld [vmem:[%s2313_s5 + $0x18] sm:$0xff] (!%p397_p10)   ;;  %v1789_v32 = vld [vmem:[%s2315_s7] sm:$0xff] (!%p397_p10)  }
  0x16   : > { %v687_v33 = vld [vmem:[%s2314_s6 + $0x38] sm:$0xff] (!%p397_p10)  ;;  %v684_v34 = vld [vmem:[%s2314_s6 + $0x20] sm:$0xff] (!%p397_p10)  ;;  %v523_v35 = vld [vmem:[%s2312_s4 + $0x8] sm:$0xff] (!%p397_p10) }
  0x17   : > { %v1790_v36 = vld [vmem:[%s2315_s7 + $0x8] sm:$0xff] (!%p397_p10)   ;;  %v686_v37 = vld [vmem:[%s2314_s6 + $0x30] sm:$0xff] (!%p397_p10)  ;;  %v525_v39 = vld [vmem:[%s2312_s4 + $0x18] sm:$0xff] (!%p397_p10) }
  0x18   : > { %705 = vperm.xlu1 (!%p397_p10), %1780, %v683_v24   ;;  %v1791_v38 = vld [vmem:[%s2315_s7 + $0x10] sm:$0xff] (!%p397_p10)   ;;  %v522_v40 = vld [vmem:[%s2312_s4] sm:$0xff] (!%p397_p10)  ;;  %v527_v41 = vld [vmem:[%s2312_s4 + $0x28] sm:$0xff] (!%p397_p10) }
  0x19   : > { %s456_s16 = scalar_select %p455_p11, %s1885_s20, 1  ;;  %695 = vperm.xlu0 %1779, %v681_v30   ;;  %v1792_v42 = vld [vmem:[%s2315_s7 + $0x18] sm:$0xff]   ;;  %v524_v43 = vld [vmem:[%s2312_s4 + $0x10] sm:$0xff]  ;;  %v526_v45 = vld [vmem:[%s2312_s4 + $0x20] sm:$0xff] }
  0x1a   : > { %v529_v44 = vld [vmem:[%s2312_s4 + $0x38] sm:$0xff]  ;;  %v837_v46 = vld [vmem:[%s2316_s8] sm:$0xff]  ;;  %v528_v47 = vld [vmem:[%s2312_s4 + $0x30] sm:$0xff]  ;;  %s2258_s20 = scalar_lea.hbm %s2319_s11, %s1598_s13 }
  0x1b   : > { %s1595_s23 = sshll.u32 %s456_s16, 5  ;;  %v838_v48 = vld [vmem:[%s2316_s8 + $0x8] sm:$0xff]  ;;  %v839_v49 = vld [vmem:[%s2316_s8 + $0x10] sm:$0xff]  ;;  %v840_v50 = vld [vmem:[%s2316_s8 + $0x18] sm:$0xff] }
  0x1c   : > { %s462_s28 = scalar_lea.vmem %s2325_s0, %s1595_s23  ;;  %s470_s25 = scalar_lea.vmem %s2309_s1, %s1595_s23  ;;  %715 = vperm.xlu1 %1780, %v685_v27   ;;  %v841_v51 = vld [vmem:[%s2316_s8 + $0x20] sm:$0xff]  ;;  %v842_v52 = vld [vmem:[%s2316_s8 + $0x28] sm:$0xff]  ;;  %v843_v53 = vld [vmem:[%s2316_s8 + $0x30] sm:$0xff] }
  0x1d   : > { %v496_v3 = vld [vmem:[%s462_s28] sm:$0xff]  ;;  %v497_v4 = vld [vmem:[%s462_s28 + $0x8] sm:$0xff]  ;;  %v498_v8 = vld [vmem:[%s462_s28 + $0x10] sm:$0xff]  ;;  %s478_s16 = scalar_lea.vmem %s2310_s2, %s1595_s23  ;;  %710 = vperm.xlu0 %1779, %v684_v34  }
  0x1e   : > { %v502_v5 = vld [vmem:[%s470_s25] sm:$0xff]  ;;  %v500_v6 = vpack.c.bf16 %v497_v4, %v496_v3  ;;  %v503_v7 = vld [vmem:[%s470_s25 + $0x8] sm:$0xff]  ;;  %v499_v9 = vld [vmem:[%s462_s28 + $0x18] sm:$0xff]  ;;  %s452_s28 = sand.u32 1, %s1877_s18  }
  0x1f   : > { %v506_v10 = vpack.c.bf16 %v503_v7, %v502_v5  ;;  %v501_v11 = vpack.c.bf16 %v499_v9, %v498_v8  ;;  %v504_v12 = vld [vmem:[%s470_s25 + $0x10] sm:$0xff]  ;;  %v505_v13 = vld [vmem:[%s470_s25 + $0x18] sm:$0xff]  ;;  %v508_v15 = vld [vmem:[%s478_s16] sm:$0xff]  ;;  %s1547_s25 = sshll.u32 %s452_s28, 5  ;;  %s2262_s24 = scalar_lea.sflag [#allocation6], %s452_s28 }
  0x20   : > { %1639 = vmatprep.subr.bf16.mxu0 %v500_v6  ;;  %v507_v14 = vpack.c.bf16 %v505_v13, %v504_v12  ;;  %v509_v17 = vld [vmem:[%s478_s16 + $0x8] sm:$0xff]  ;;  %v510_v18 = vld [vmem:[%s478_s16 + $0x10] sm:$0xff]  ;;  %v511_v21 = vld [vmem:[%s478_s16 + $0x18] sm:$0xff]  ;;  %725 = vperm.xlu1 %1780, %v687_v33   ;;  %s454_s0 = scalar_lea.vmem [#allocation5], %s1547_s25  ;;  %s1898_s16 = smov [#allocation5]  }
  0x21   : > { %1651 = vmatprep.subr.bf16.mxu1 %v506_v10  ;;  %1640 = vmatpush3.bf16.msra.mxu0 %v500_v6  ;;  %v512_v19 = vpack.c.bf16 %v509_v17, %v508_v15  ;;  %v513_v26 = vpack.c.bf16 %v511_v21, %v510_v18  ;;  %v844_v54 = vld [vmem:[%s2316_s8 + $0x38] sm:$0xff]  ;;  %v1317_v55 = vld [vmem:[%s2318_s10] sm:$0xff]  ;;  %v1318_v56 = vld [vmem:[%s2318_s10 + $0x8] sm:$0xff]  ;;  %s1425_s12 = sshll.u32 %s454_s0, 4  ;;  %s1819_s23 = sshll.u32 %s1898_s16, 4  ;;  %s2252_s12 = int_to_ptr.vmem [resolvable:$true] %s1425_s12  ;;  %s1820_s23 = int_to_ptr.vmem [resolvable:$false] %s1819_s23 }
  0x22   : > { %1652 = vmatpush3.bf16.msra.mxu1 %v506_v10  ;;  %1641 = vmatprep.subr.bf16.mxu0 %v501_v11  ;;  %v1319_v57 = vld [vmem:[%s2318_s10 + $0x10] sm:$0xff]  ;;  %s1815_s26 = scalar_lea.vmem %s2252_s12, 512  ;;  %s1821_s25 = scalar_lea.vmem %s1820_s23, 1024 }
  0x23   : > { %1653 = vmatprep.subr.bf16.mxu1 %v507_v14  ;;  %720 = vperm.xlu0 %1779, %v686_v37   ;;  %p1816_p12 = scmp.ne.s32.totalorder %s2252_s12, %s1815_s26  ;;  %p1822_p1 = scmp.lt.s32.totalorder %s2252_s12, %s1820_s23 }
  0x24   : > { %537 = vperm.xlu1 %1780, %v523_v35   ;;  %p1823_p2 = scmp.lt.s32.totalorder %s1821_s25, %s1815_s26 }
  0x25   : > { %1642 = vmatpush3.bf16.msra.mxu0 %v501_v11  ;;  %p1817_p13 = pnand %p1816_p12, %p2001_p4 }
  0x26   : > { %1654 = vmatpush3.bf16.msra.mxu1 %v507_v14  ;;  %1663 = vmatprep.subr.bf16.mxu0 %v512_v19  ;;  %p1824_p3 = por %p1823_p2, %p1822_p1 }
  0x27   : > { %532 = vperm.xlu0 %1779, %v522_v40   ;;  %p1818_p0 = pneg %p1817_p13 }
  0x28   : > { %1644 = vmatmul.mubr.msk.bf16.vlgmr.msra.gmra.mrb[0].mxu0 %vm590_vm0, %v1783_v16  ;;  %547 = vperm.xlu1 %1780, %v525_v39  }
  0x29   : > { %1656 = vmatmul.mubr.msk.bf16.vlgmr.msra.gmra.mrb[0].mxu1 %vm590_vm0, %v1784_v22  ;;  %1647 = vmatprep.mubr.msk.bf16.mxu0 %vm590_vm0, %v1785_v23  ;;  %p1825_p5 = pnand %p1824_p3, %p1818_p0 }
  0x2a   : > { %1659 = vmatprep.mubr.msk.bf16.mxu1 %vm590_vm0, %v1786_v25  ;;  %1664 = vmatpush3.bf16.msra.mxu0 %v512_v19 }
  0x2b   : > { %1665 = vmatprep.subr.bf16.mxu0 %v513_v26  ;;  %542 = vperm.xlu0 %1779, %v524_v43  }
  0x2c   : > { %557 = vperm.xlu1 %1780, %v527_v41  }
  0x2e   : > { %1666 = vmatpush3.bf16.msra.mxu0 %v513_v26 }
  0x2f   : > { %552 = vperm.xlu0 %1779, %v526_v45  }
  0x30   : > { %1648 = vmatmul.mubr.msk.bf16.gmra.mrb[4].mxu0 %vm590_vm0, %v1787_v29  ;;  %567 = vperm.xlu1 %1780, %v529_v44  }
  0x31   : > { %1660 = vmatmul.mubr.msk.bf16.gmra.mrb[4].mxu1 %vm590_vm0, %v1788_v31  ;;  %1667 = vmatprep.mubr.msk.bf16.mxu0 %vm590_vm0, %v1789_v32 }
  0x33   : > { %562 = vperm.xlu0 %1779, %v528_v47  }
  0x34   : > { %847 = vperm.xlu1 %1780, %v837_v46  }
  0x38   : > { %1668 = vmatmul.mubr.msk.bf16.vlgmr.msra.gmra.mrb[8].mxu0 %vm590_vm0, %v1790_v36  ;;  %852 = vperm.xlu1 %1780, %v838_v48  }
  0x39   : > { %1671 = vmatprep.mubr.msk.bf16.mxu0 %vm590_vm0, %v1791_v38 }
  0x3c   : > { %857 = vperm.xlu1 %1780, %v839_v49  }
  0x40   : > { %1672 = vmatmul.mubr.msk.bf16.gmra.mrb[12].mxu0 %vm590_vm0, %v1792_v42  ;;  %862 = vperm.xlu1 %1780, %v840_v50  }
  0x44   : > { %867 = vperm.xlu1 %1780, %v841_v51  }
  0x48   : > { %872 = vperm.xlu1 %1780, %v842_v52  }
  0x4c   : > { %877 = vperm.xlu1 %1780, %v843_v53  }
  0x50   : > { %882 = vperm.xlu1 %1780, %v844_v54  }
  0x54   : > { %1323 = vperm.xlu1 %1780, %v1317_v55  }
  0x58   : > { %1328 = vperm.xlu1 %1780, %v1318_v56  }
  0x5c   : > { %1333 = vperm.xlu1 %1780, %v1319_v57  }
  0x93   : > { %v701_v58 = vpop.permute.xlu1 %700 }
  0x94   : > { %v691_v63 = vpop.permute.xlu0 %690 }
  0x97   : > { %v706_v59 = vpop.permute.xlu1 %705 }
  0x98   : > { %v696_v1 = vpop.permute.xlu0 %695 }
  0x9b   : > { %v716_v60 = vpop.permute.xlu1 %715 }
  0x9c   : > { %v711_v3 = vpop.permute.xlu0 %710 }
  0x9f   : > { %v726_v61 = vpop.permute.xlu1 %725 }
  0xa2   : > { %v721_v5 = vpop.permute.xlu0 %720 }
  0xa3   : > { %v538_v62 = vpop.permute.xlu1 %537 }
  0xa6   : > { %v533_v7 = vpop.permute.xlu0 %532 }
  0xa7   : > { %v548_v0 = vpop.permute.xlu1 %547 }
  0xaa   : > { %v543_v9 = vpop.permute.xlu0 %542 }
  0xab   : > { %v558_v2 = vpop.permute.xlu1 %557 }
  0xae   : > { %v553_v11 = vpop.permute.xlu0 %552 }
  0xaf   : > { %v568_v4 = vpop.permute.xlu1 %567 }
  0xb2   : > { %v563_v32 = vpop.permute.xlu0 %562 }
  0xb3   : > { %v2156_v6 = vpop.permute.xlu1 %847 }
  0xb7   : > { %v2158_v8 = vpop.permute.xlu1 %852 }
  0xbb   : > { %v858_v10 = vpop.permute.xlu1 %857 }
  0xbf   : > { %v863_v12 = vpop.permute.xlu1 %862 }
  0xc3   : > { %v868_v34 = vpop.permute.xlu1 %867 }
  0xc7   : > { %v873_v52 = vpop.permute.xlu1 %872 }
  0xfb   : > { %v1645_v13 = vpop.f32.mrb[0].mxu0 }
  0xfc   : > { %v1657_v14 = vpop.f32.mrb[0].mxu1  ;;  %v637_v15 = vpop.f32.mrb[1].mxu0  ;;  %v646_v18 = vadd.f32 %v1645_v13, %v543_v9 }
  0xfd   : > { %v794_v16 = vpop.f32.mrb[1].mxu1  ;;  %v1646_v17 = vpop.f32.mrb[2].mxu0  ;;  %v803_v22 = vadd.f32 %v1657_v14, %v701_v58  ;;  %v638_v23 = vadd.f32 %v637_v15, %v533_v7 }
  0xfe   : > { %v649_v19 = vadd.f32 %v1646_v17, %v548_v0  ;;  %v1658_v20 = vpop.f32.mrb[2].mxu1  ;;  %v640_v21 = vpop.f32.mrb[3].mxu0  ;;  %v795_v27 = vadd.f32 %v794_v16, %v691_v63 }
  0xff   : > { %v806_v24 = vadd.f32 %v1658_v20, %v706_v59  ;;  %v641_v25 = vadd.f32 %v640_v21, %v538_v62  ;;  %v797_v26 = vpop.f32.mrb[3].mxu1  ;;  %v878_v63 = vpop.permute.xlu1 %877  ;;  %v1897_v20 = vmov 0.0  }
 0x100   : > { %v669_v28 = vpack.c.bf16 %v649_v19, %v646_v18  ;;  %v798_v29 = vadd.f32 %v797_v26, %v696_v1  ;;  %v1896_v19 = vmov -inf   ;;  %486 = vst.msk [vmem:[#allocation3] sm:$0x1] %vm484_vm2, %v1897_v20 }
 0x101   : > { %v826_v30 = vpack.c.bf16 %v806_v24, %v803_v22  ;;  %v668_v31 = vpack.c.bf16 %v641_v25, %v638_v23  ;;  %485 = vst.msk [vmem:[#allocation2] sm:$0x1] %vm484_vm2, %v1896_v19 }
 0x102   : > { %v825_v33 = vpack.c.bf16 %v798_v29, %v795_v27  ;;  %488 = vst.msk [vmem:[#allocation4] sm:$0xff] %vm487_vm1, %v1897_v20  ;;  %489 = vst.msk [vmem:[#allocation4 + $0x8] sm:$0xff] %vm487_vm1, %v1897_v20 }
 0x103   : > { %v1649_v35 = vpop.f32.mrb[4].mxu0  ;;  %1675 = vmatprep.subr.bf16.mxu1 %v668_v31  ;;  %490 = vst.msk [vmem:[#allocation4 + $0x10] sm:$0xff] %vm487_vm1, %v1897_v20  ;;  %491 = vst.msk [vmem:[#allocation4 + $0x18] sm:$0xff] %vm487_vm1, %v1897_v20 }
 0x104   : > { %v1661_v36 = vpop.f32.mrb[4].mxu1  ;;  %986 = vxpose.xlu0.c.b16.start [1/4] (short) (narrow) %v825_v33, 64  ;;  %v653_v37 = vpop.f32.mrb[5].mxu0  ;;  %1676 = vmatpush3.bf16.msra.mxu1 %v668_v31  ;;  %v662_v40 = vadd.f32 %v1649_v35, %v563_v32  ;;  %492 = vst.msk [vmem:[#allocation4 + $0x20] sm:$0xff] %vm487_vm1, %v1897_v20  ;;  %493 = vst.msk [vmem:[#allocation4 + $0x28] sm:$0xff] %vm487_vm1, %v1897_v20 }
 0x105   : > { %v810_v38 = vpop.f32.mrb[5].mxu1  ;;  %v1650_v39 = vpop.f32.mrb[6].mxu0  ;;  %1677 = vmatprep.subr.bf16.mxu1 %v669_v28  ;;  %v819_v44 = vadd.f32 %v1661_v36, %v721_v5  ;;  %v654_v45 = vadd.f32 %v653_v37, %v553_v11  ;;  %494 = vst.msk [vmem:[#allocation4 + $0x30] sm:$0xff] %vm487_vm1, %v1897_v20  ;;  %495 = vst.msk [vmem:[#allocation4 + $0x38] sm:$0xff] %vm487_vm1, %v1897_v20 }
 0x106   : > { %v665_v41 = vadd.f32 %v1650_v39, %v568_v4  ;;  %v1662_v42 = vpop.f32.mrb[6].mxu1  ;;  %v656_v43 = vpop.f32.mrb[7].mxu0  ;;  %v811_v49 = vadd.f32 %v810_v38, %v711_v3 }
 0x107   : > { %v822_v46 = vadd.f32 %v1662_v42, %v726_v61  ;;  %v657_v47 = vadd.f32 %v656_v43, %v558_v2  ;;  %v813_v48 = vpop.f32.mrb[7].mxu1  ;;  %v883_v5 = vpop.permute.xlu1 %882 }
 0x108   : > { %v671_v50 = vpack.c.bf16 %v665_v41, %v662_v40  ;;  %v814_v51 = vadd.f32 %v813_v48, %v716_v60  ;;  %987 = vxpose.xlu0.c.b16.cont [2/4] (short) (narrow) %v826_v30, 64  ;;  %1678 = vmatpush3.bf16.msra.mxu1 %v669_v28 }
 0x109   : > { %v828_v53 = vpack.c.bf16 %v822_v46, %v819_v44  ;;  %v670_v54 = vpack.c.bf16 %v657_v47, %v654_v45  ;;  %v1107_v46 = vlaneseq }
 0x10a   : > { %v827_v55 = vpack.c.bf16 %v814_v51, %v811_v49  ;;  %v1080_v51 = vld [vmem:[#allocation2] sm:$0x1] }
 0x10b   : > { %v1669_v56 = vpop.f32.mrb[8].mxu0  ;;  %1679 = vmatprep.subr.bf16.mxu1 %v670_v54  ;;  %v1108_v49 = vshrl.u32 %v1107_v46, 7 }
 0x10c   : > { %988 = vxpose.xlu0.c.b16.cont [3/4] (short) (narrow) %v827_v55, 64  ;;  %v951_v57 = vpop.f32.mrb[9].mxu0  ;;  %1680 = vmatpush3.bf16.msra.mxu1 %v670_v54  ;;  %v2160_v59 = vadd.f32 %v1669_v56, %v858_v10 }
 0x10d   : > { %v1670_v58 = vpop.f32.mrb[10].mxu0  ;;  %1681 = vmatprep.subr.bf16.mxu1 %v671_v50  ;;  %v952_v60 = vadd.f32 %v951_v57, %v2156_v6 }
 0x10e   : > { %v2162_v61 = vadd.f32 %v1670_v58, %v863_v12  ;;  %v954_v62 = vpop.f32.mrb[11].mxu0 }
 0x10f   : > { %v955_v0 = vadd.f32 %v954_v62, %v2158_v8  ;;  %v1320_v8 = vld [vmem:[%s2318_s10 + $0x18] sm:$0xff] }
 0x110   : > { %v983_v1 = vpack.c.bf16 %v2162_v61, %v2160_v59  ;;  %989 = vxpose.xlu0.c.b16.end [4/4] (short) (narrow) %v828_v53, 64  ;;  %1682 = vmatpush3.bf16.msra.mxu1 %v671_v50  ;;  %v2206_v53 = vsub.s32 0, %v1108_v49  ;;  %v1793_v61 = vld [vmem:[%s2317_s9] sm:$0xff]  }
 0x111   : > { %v982_v2 = vpack.c.bf16 %v955_v0, %v952_v60 }
 0x113   : > { %v1673_v3 = vpop.f32.mrb[12].mxu0  ;;  %1699 = vmatprep.mubr.msk.bf16.mxu0 %vm487_vm1, %v982_v2 }
 0x114   : > { %v967_v4 = vpop.f32.mrb[13].mxu0  ;;  %v2169_v9 = vadd.f32 %v1673_v3, %v878_v63 }
 0x115   : > { %v1674_v7 = vpop.f32.mrb[14].mxu0  ;;  %v2176_v11 = vadd.f32 %v967_v4, %v868_v34 }
 0x116   : > { %v2171_v10 = vadd.f32 %v1674_v7, %v883_v5  ;;  %v970_v6 = vpop.f32.mrb[15].mxu0 }
 0x117   : > { %v2178_v12 = vadd.f32 %v970_v6, %v873_v52 }
 0x118   : > { %v985_v13 = vpack.c.bf16 %v2171_v10, %v2169_v9 }
 0x119   : > { %v984_v14 = vpack.c.bf16 %v2178_v12, %v2176_v11  ;;  %1338 = vperm.xlu0 %1779, %v1320_v8   ;;  %v1164_v11 = vld [vmem:[#allocation4 + $0x10] sm:$0xff] }
 0x16a   : > { %v994_v15 = vpop.trf.xlu0 }
 0x16b   : > { %1683 = vmatprep.mubr.msk.bf16.mxu1 %vm487_vm1, %v994_v15 }
 0x16e   : > { %v995_v16 = vpop.trf.xlu0 }
 0x16f   : > { %1684 = vmatmul.mubr.msk.bf16.vlgmr.msra.gmra.mrb[8].mxu1 %vm487_vm1, %v995_v16 }
 0x172   : > { %v996_v17 = vpop.trf.xlu0 }
 0x173   : > { %1687 = vmatprep.mubr.msk.bf16.mxu1 %vm487_vm1, %v996_v17 }
 0x176   : > { %v997_v18 = vpop.trf.xlu0 }
 0x177   : > { %1688 = vmatmul.mubr.msk.bf16.gmra.mrb[12].mxu1 %vm487_vm1, %v997_v18 }
 0x178   : > { %1715 = vmatprep.mubr.msk.bf16.mxu1 %vm487_vm1, %v1793_v61 }
 0x198   : > { %v1339_v61 = vpop.permute.xlu0 %1338 }
 0x242   : > { %v1685_v21 = vpop.f32.mrb[8].mxu1 }
 0x243   : > { %v1049_v22 = vpop.f32.mrb[9].mxu1  ;;  %v1083_v26 = vsel %vm487_vm1, %v1685_v21, -inf }
 0x244   : > { %v1686_v23 = vpop.f32.mrb[10].mxu1  ;;  %v1081_v29 = vsel %vm487_vm1, %v1049_v22, -inf }
 0x245   : > { %v1052_v24 = vpop.f32.mrb[11].mxu1  ;;  %v1084_v33 = vsel %vm487_vm1, %v1686_v23, -inf }
 0x246   : > { %v1082_v37 = vsel %vm487_vm1, %v1052_v24, -inf }
 0x24a   : > { %v1689_v25 = vpop.f32.mrb[12].mxu1 }
 0x24b   : > { %v1089_v27 = vsel %vm487_vm1, %v1689_v25, -inf  ;;  %v1065_v28 = vpop.f32.mrb[13].mxu1 }
 0x24c   : > { %v1090_v30 = vmax.f32 %v1083_v26, %v1089_v27  ;;  %v1085_v31 = vsel %vm487_vm1, %v1065_v28, -inf  ;;  %v1690_v32 = vpop.f32.mrb[14].mxu1 }
 0x24d   : > { %v1086_v34 = vmax.f32 %v1081_v29, %v1085_v31  ;;  %v1091_v35 = vsel %vm487_vm1, %v1690_v32, -inf  ;;  %v1068_v36 = vpop.f32.mrb[15].mxu1 }
 0x24e   : > { %v1092_v38 = vmax.f32 %v1084_v33, %v1091_v35  ;;  %v1087_v39 = vsel %vm487_vm1, %v1068_v36, -inf }
 0x24f   : > { %v1088_v40 = vmax.f32 %v1082_v37, %v1087_v39 }
 0x250   : > { %v1094_v41 = vmax.f32 %v1090_v30, %v1092_v38 }
 0x251   : > { %v1093_v42 = vmax.f32 %v1086_v34, %v1088_v40 }
 0x253   : > { %v1095_v43 = vmax.f32 %v1093_v42, %v1094_v41 }
 0x255   : > { %v1096_v44 = vrot.slane %v1095_v43, 4 }
 0x257   : > { %v1097_v45 = vmax.f32 %v1095_v43, %v1096_v44 }
 0x259   : > { %v1098_v47 = vrot.slane %v1097_v45, 2 }
 0x25b   : > { %v1099_v48 = vmax.f32 %v1097_v45, %v1098_v47 }
 0x25d   : > { %v1100_v50 = vrot.slane %v1099_v48, 1 }
 0x25f   : > { %v1101_v52 = vmax.f32 %v1099_v48, %v1100_v50 }
 0x261   : > { %v1102_v54 = vmax.f32 %v1080_v51, %v1101_v52 }
 0x263   : > { %v1110_v55 = vrot.slane %v1102_v54, %v2206_v53  ;;  %1281 = vst.msk [vmem:[#allocation2] sm:$0x1] %vm484_vm2, %v1102_v54  ;;  %v1103_v31 = vsub.f32 %v1080_v51, %v1102_v54  ;;  %v1136_v51 = vld [vmem:[#allocation3] sm:$0x1] }
 0x265   : > { %v1112_v56 = vsub.f32 %v1049_v22, %v1110_v55  ;;  %v1113_v57 = vsub.f32 %v1052_v24, %v1110_v55  ;;  %v1114_v58 = vsub.f32 %v1685_v21, %v1110_v55  ;;  %v1115_v62 = vsub.f32 %v1686_v23, %v1110_v55 }
 0x266   : > { %v1116_v63 = vsub.f32 %v1065_v28, %v1110_v55  ;;  %v1117_v60 = vsub.f32 %v1068_v36, %v1110_v55  ;;  %v1118_v0 = vsub.f32 %v1689_v25, %v1110_v55  ;;  %v1119_v7 = vsub.f32 %v1690_v32, %v1110_v55 }
 0x267   : > { %v1120_v2 = vmul.f32 1.442695, %v1112_v56  ;;  %v1122_v3 = vmul.f32 1.442695, %v1113_v57  ;;  %v1124_v4 = vmul.f32 1.442695, %v1114_v58 }
 0x268   : > { %v1126_v5 = vmul.f32 1.442695, %v1115_v62  ;;  %v1128_v6 = vmul.f32 1.442695, %v1116_v63  ;;  %v1130_v8 = vmul.f32 1.442695, %v1117_v60 }
 0x269   : > { %1795 = vpow2.f32 %v1120_v2  ;;  %v1132_v15 = vmul.f32 1.442695, %v1118_v0  ;;  %v1134_v16 = vmul.f32 1.442695, %v1119_v7  ;;  %v1104_v39 = vmul.f32 1.442695, %v1103_v31 }
 0x26a   : > { %1797 = vpow2.f32 %v1122_v3  ;;  %v1165_v56 = vld [vmem:[#allocation4 + $0x18] sm:$0xff]  ;;  %v1163_v58 = vld [vmem:[#allocation4 + $0x8] sm:$0xff]  ;;  %v1168_v7 = vld [vmem:[#allocation4 + $0x30] sm:$0xff] }
 0x26b   : > { %1799 = vpow2.f32 %v1124_v4 }
 0x26c   : > { %1801 = vpow2.f32 %v1126_v5 }
 0x26d   : > { %1803 = vpow2.f32 %v1128_v6  ;;  %v1166_v6 = vld [vmem:[#allocation4 + $0x20] sm:$0xff] }
 0x26e   : > { %1805 = vpow2.f32 %v1130_v8  ;;  %v1169_v8 = vld [vmem:[#allocation4 + $0x38] sm:$0xff] }
 0x26f   : > { %1807 = vpow2.f32 %v1132_v15 }
 0x270   : > { %1809 = vpow2.f32 %v1134_v16  ;;  %v1167_v16 = vld [vmem:[#allocation4 + $0x28] sm:$0xff] }
 0x271   : > { %1811 = vpow2.f32 %v1104_v39 }
 0x273   : > { %v1796_v17 = vpop.eup %1795 }
 0x274   : > { %v1798_v18 = vpop.eup %1797  ;;  %v1138_v19 = vsel %vm487_vm1, %v1796_v17, 0.0 }
 0x275   : > { %v1800_v20 = vpop.eup %1799  ;;  %v1139_v21 = vsel %vm487_vm1, %v1798_v18, 0.0  ;;  %v1184_v22 = vpack.c.bf16 %v1798_v18, %v1796_v17 }
 0x276   : > { %v1802_v23 = vpop.eup %1801  ;;  %v1140_v24 = vadd.f32 %v1139_v21, %v1138_v19  ;;  %v1141_v26 = vsel %vm487_vm1, %v1800_v20, 0.0 }
 0x277   : > { %v1804_v25 = vpop.eup %1803  ;;  %1691 = vmatprep.subr.bf16.mxu0 %v1184_v22  ;;  %v1185_v27 = vpack.c.bf16 %v1802_v23, %v1800_v20  ;;  %v1143_v32 = vsel %vm487_vm1, %v1802_v23, 0.0 }
 0x278   : > { %v1806_v28 = vpop.eup %1805  ;;  %v1142_v29 = vadd.f32 %v1141_v26, %v1140_v24  ;;  %1692 = vmatpush3.bf16.msra.mxu0 %v1184_v22  ;;  %v1145_v36 = vsel %vm487_vm1, %v1804_v25, 0.0 }
 0x279   : > { %v1808_v30 = vpop.eup %1807  ;;  %1693 = vmatprep.subr.bf16.mxu0 %v1185_v27  ;;  %v1186_v33 = vpack.c.bf16 %v1806_v28, %v1804_v25  ;;  %v1147_v40 = vsel %vm487_vm1, %v1806_v28, 0.0 }
 0x27a   : > { %v1810_v34 = vpop.eup %1809  ;;  %v1144_v35 = vadd.f32 %v1143_v32, %v1142_v29  ;;  %v1149_v42 = vsel %vm487_vm1, %v1808_v30, 0.0 }
 0x27b   : > { %v1187_v37 = vpack.c.bf16 %v1810_v34, %v1808_v30  ;;  %v1151_v44 = vsel %vm487_vm1, %v1810_v34, 0.0  ;;  %v1812_v50 = vpop.eup %1811 }
 0x27c   : > { %v1146_v38 = vadd.f32 %v1145_v36, %v1144_v35  ;;  %1694 = vmatpush3.bf16.msra.mxu0 %v1185_v27  ;;  %v1137_v54 = vmul.f32 %v1812_v50, %v1136_v51 }
 0x27d   : > { %1695 = vmatprep.subr.bf16.mxu0 %v1186_v33 }
 0x27e   : > { %v1148_v41 = vadd.f32 %v1147_v40, %v1146_v38 }
 0x280   : > { %1696 = vmatpush3.bf16.msra.mxu0 %v1186_v33  ;;  %v1150_v43 = vadd.f32 %v1149_v42, %v1148_v41 }
 0x281   : > { %1697 = vmatprep.subr.bf16.mxu0 %v1187_v37 }
 0x282   : > { %v1152_v45 = vadd.f32 %v1151_v44, %v1150_v43 }
 0x284   : > { %v1153_v46 = vrot.slane %v1152_v45, 4  ;;  %1698 = vmatpush3.bf16.msra.mxu0 %v1187_v37 }
 0x286   : > { %v1154_v47 = vadd.f32 %v1153_v46, %v1152_v45 }
 0x287   : > { %1700 = vmatmul.mubr.msk.bf16.vlgmr.msra.gmra.mrb[16].mxu0 %vm487_vm1, %v983_v1  ;;  %v1174_v1 = vrot.slane %v1812_v50, %v2206_v53  ;;  %v1324_v50 = vpop.permute.xlu1 %1323 }
 0x288   : > { %v1155_v48 = vrot.slane %v1154_v47, 2  ;;  %1703 = vmatprep.mubr.msk.bf16.mxu0 %vm487_vm1, %v984_v14  ;;  %v1162_v14 = vld [vmem:[#allocation4] sm:$0xff] }
 0x289   : > { %v1178_v57 = vmul.f32 %v1174_v1, %v1164_v11  ;;  %v1176_v10 = vmul.f32 %v1174_v1, %v1162_v14  ;;  %v1179_v63 = vmul.f32 %v1174_v1, %v1165_v56  ;;  %v1177_v2 = vmul.f32 %v1174_v1, %v1163_v58 }
 0x28a   : > { %v1156_v49 = vadd.f32 %v1155_v48, %v1154_v47  ;;  %v1182_v15 = vmul.f32 %v1174_v1, %v1168_v7  ;;  %v1180_v18 = vmul.f32 %v1174_v1, %v1166_v6  ;;  %v1183_v22 = vmul.f32 %v1174_v1, %v1169_v8 }
 0x28b   : > { %v1181_v25 = vmul.f32 %v1174_v1, %v1167_v16  ;;  %v1329_v51 = vpop.permute.xlu1 %1328 }
 0x28c   : > { %v1157_v52 = vrot.slane %v1156_v49, 1 }
 0x28e   : > { %v1158_v55 = vadd.f32 %v1157_v52, %v1156_v49  ;;  %v1794_v49 = vld [vmem:[%s2317_s9 + $0x8] sm:$0xff]  }
 0x28f   : > { %1704 = vmatmul.mubr.msk.bf16.gmra.mrb[20].mxu0 %vm487_vm1, %v985_v13  ;;  %v1334_v52 = vpop.permute.xlu1 %1333 }
 0x290   : > { %v1159_v59 = vadd.f32 %v1158_v55, %v1137_v54 }
 0x292   : > { %1161 = vst.msk [vmem:[#allocation3] sm:$0x1] %vm484_vm2, %v1159_v59 }
 0x299   : > { %v1293_v12 = vld [vmem:[#allocation3] sm:$0x1] }
 0x29a   : > { %1813 = vrcp.f32 %v1293_v12 }
 0x2a4   : > { %v1814_v19 = vpop.eup %1813 }
 0x2a5   : > { %v1299_v30 = vrot.slane %v1814_v19, %v2206_v53 }
 0x35a   : > { %v1701_v9 = vpop.f32.mrb[16].mxu0 }
 0x35b   : > { %v1267_v13 = vadd.f32 %v1701_v9, %v1178_v57  ;;  %v1234_v62 = vpop.f32.mrb[17].mxu0 }
 0x35c   : > { %v1265_v60 = vadd.f32 %v1234_v62, %v1176_v10  ;;  %v1702_v0 = vpop.f32.mrb[18].mxu0 }
 0x35d   : > { %1275 = vst.msk [vmem:[#allocation4 + $0x10] sm:$0xff] %vm487_vm1, %v1267_v13  ;;  %v1268_v3 = vadd.f32 %v1702_v0, %v1179_v63  ;;  %v1237_v4 = vpop.f32.mrb[19].mxu0 }
 0x35e   : > { %1273 = vst.msk [vmem:[#allocation4] sm:$0xff] %vm487_vm1, %v1265_v60  ;;  %v1266_v5 = vadd.f32 %v1237_v4, %v1177_v2 }
 0x35f   : > { %1276 = vst.msk [vmem:[#allocation4 + $0x18] sm:$0xff] %vm487_vm1, %v1268_v3 }
 0x360   : > { %1274 = vst.msk [vmem:[#allocation4 + $0x8] sm:$0xff] %vm487_vm1, %v1266_v5 }
 0x362   : > { %v1705_v17 = vpop.f32.mrb[20].mxu0 }
 0x363   : > { %v1271_v20 = vadd.f32 %v1705_v17, %v1182_v15  ;;  %v1250_v21 = vpop.f32.mrb[21].mxu0 }
 0x364   : > { %v1269_v23 = vadd.f32 %v1250_v21, %v1180_v18  ;;  %v1706_v24 = vpop.f32.mrb[22].mxu0  ;;  %v1287_v33 = vld [vmem:[#allocation4 + $0x10] sm:$0xff] }
 0x365   : > { %1279 = vst.msk [vmem:[#allocation4 + $0x30] sm:$0xff] %vm487_vm1, %v1271_v20  ;;  %v1272_v26 = vadd.f32 %v1706_v24, %v1183_v22  ;;  %v1253_v27 = vpop.f32.mrb[23].mxu0  ;;  %v1285_v28 = vld [vmem:[#allocation4] sm:$0xff]  ;;  %v1303_v38 = vmul.f32 %v1299_v30, %v1287_v33 }
 0x366   : > { %1277 = vst.msk [vmem:[#allocation4 + $0x20] sm:$0xff] %vm487_vm1, %v1269_v23  ;;  %v1270_v29 = vadd.f32 %v1253_v27, %v1181_v25  ;;  %v1288_v31 = vld [vmem:[#allocation4 + $0x18] sm:$0xff]  ;;  %v1301_v34 = vmul.f32 %v1299_v30, %v1285_v28 }
 0x367   : > { %1280 = vst.msk [vmem:[#allocation4 + $0x38] sm:$0xff] %vm487_vm1, %v1272_v26  ;;  %v1286_v32 = vld [vmem:[#allocation4 + $0x8] sm:$0xff]  ;;  %v1304_v36 = vmul.f32 %v1299_v30, %v1288_v31 }
 0x368   : > { %1278 = vst.msk [vmem:[#allocation4 + $0x28] sm:$0xff] %vm487_vm1, %v1270_v29  ;;  %v1302_v35 = vmul.f32 %v1299_v30, %v1286_v32 }
 0x369   : > { %v1310_v39 = vpack.c.bf16 %v1304_v36, %v1303_v38 }
 0x36a   : > { %v1309_v37 = vpack.c.bf16 %v1302_v35, %v1301_v34 }
 0x36c   : > { %1707 = vmatprep.subr.bf16.mxu1 %v1309_v37  ;;  %v1291_v53 = vld [vmem:[#allocation4 + $0x30] sm:$0xff] }
 0x36d   : > { %1708 = vmatpush3.bf16.msra.mxu1 %v1309_v37  ;;  %v1289_v40 = vld [vmem:[#allocation4 + $0x20] sm:$0xff]  ;;  %v1307_v47 = vmul.f32 %v1299_v30, %v1291_v53 }
 0x36e   : > { %1709 = vmatprep.subr.bf16.mxu1 %v1310_v39  ;;  %v1292_v41 = vld [vmem:[#allocation4 + $0x38] sm:$0xff]  ;;  %v1305_v43 = vmul.f32 %v1299_v30, %v1289_v40 }
 0x36f   : > { %v1290_v42 = vld [vmem:[#allocation4 + $0x28] sm:$0xff]  ;;  %v1308_v45 = vmul.f32 %v1299_v30, %v1292_v41 }
 0x370   : > { %v1306_v44 = vmul.f32 %v1299_v30, %v1290_v42 }
 0x371   : > { %1710 = vmatpush3.bf16.msra.mxu1 %v1310_v39  ;;  %v1312_v48 = vpack.c.bf16 %v1308_v45, %v1307_v47 }
 0x372   : > { %v1311_v46 = vpack.c.bf16 %v1306_v44, %v1305_v43 }
 0x374   : > { %1711 = vmatprep.subr.bf16.mxu1 %v1311_v46 }
 0x375   : > { %1712 = vmatpush3.bf16.msra.mxu1 %v1311_v46 }
 0x376   : > { %1713 = vmatprep.subr.bf16.mxu1 %v1312_v48 }
 0x379   : > { %1714 = vmatpush3.bf16.msra.mxu1 %v1312_v48 }
 0x37c   : > { %1716 = vmatmul.mubr.msk.bf16.vlgmr.msra.gmra.mrb[16].mxu1 %vm487_vm1, %v1794_v49 }
 0x44f   : > { %v1717_v54 = vpop.f32.mrb[16].mxu1 }
 0x450   : > { %v1400_v55 = vadd.f32 %v1717_v54, %v1334_v52  ;;  %v1391_v59 = vpop.f32.mrb[17].mxu1 }
 0x451   : > { %v1392_v1 = vadd.f32 %v1391_v59, %v1324_v50  ;;  %v1718_v11 = vpop.f32.mrb[18].mxu1 }
 0x452   : > { %1408 = vst.msk [vmem:[%s454_s0 + $0x10] sm:$0xff] %vm487_vm1, %v1400_v55  ;;  %v1403_v12 = vadd.f32 %v1718_v11, %v1339_v61  ;;  %v1394_v14 = vpop.f32.mrb[19].mxu1 }
 0x453   : > { %1406 = vst.msk [vmem:[%s454_s0] sm:$0xff] %vm487_vm1, %v1392_v1  ;;  %v1395_v56 = vadd.f32 %v1394_v14, %v1329_v51 }
 0x454   : > { %1409 = vst.msk [vmem:[%s454_s0 + $0x18] sm:$0xff] %vm487_vm1, %v1403_v12 }
 0x455   : > { %1407 = vst.msk [vmem:[%s454_s0 + $0x8] sm:$0xff] %vm487_vm1, %v1395_v56 }
 0x456   : > { %1828 = shalt.err (!%p1825_p5)
}
 0x457   : > { %s1829_s28 = scalar_lea.hbm %s2258_s20, 512  ;;  %s1833_s14 = scalar_lea.hbm %s2319_s11, 1024 }
 0x458   : > { %p1830_p6 = scmp.ne.s32.totalorder %s2258_s20, %s1829_s28  ;;  %p1834_p10 = scmp.lt.u32.totalorder %s2258_s20, %s2319_s11 }
 0x459   : > { %p1835_p11 = scmp.lt.u32.totalorder %s1833_s14, %s1829_s28  ;;  %p1837_p13 = scmp.lt.u32.totalorder %s1829_s28, %s2258_s20 }
 0x45a   : > { %p1831_p7 = pnand %p1830_p6, %p2001_p4 }
 0x45b   : > { %p1836_p12 = por %p1835_p11, %p1834_p10 }
 0x45c   : > { %p1832_p9 = pneg %p1831_p7 }
 0x45d   : > { %p1838_p0 = por %p1837_p13, %p1836_p12 }
 0x45f   : > { %p1839_p1 = pnand %p1838_p0, %p1832_p9 }
 0x461   : > { %1842 = shalt.err (!%p1839_p1)
}
 0x462   : > { %s1899_s26 = smov 128   ;;  %s1900_s23 = smov 8  }
 0x463   : > { %1719 = dma.vmem_to_hbm [thread:$0]  (%p2001_p4), %s2252_s12, 512, %s2258_s20, %s2262_s24, %s1899_s26, %s1899_s26, %s1900_s23  }
 0x464 PF: > { %p1725_p2 = scmp.ge.s32.totalorder %s1893_s22, 2  ;;  %s1440_s25 = sand.u32 1, %s1873_s17  }
 0x465   : > { %s1441_s28 = scalar_lea.sflag [#allocation6], %s1440_s25 }
 0x466   : > { %p1722_p3 = pnand %p1725_p2, %p2008_p8 }
 0x468   : > { %1868 = dma.done.wait (!%p1722_p3), %s1441_s28, 512  }
 0x469   : > { %1870 = vsyncadd (!%p1722_p3), %s1441_s28, 4294966784  ;;  %s24_s22 = sadd.s32 1, %s1893_s22   ;;  %s2326_s27 = sld [smem:[#allocation8_spill]] }
 0x46a   : > { %p21_p5 = scmp.ge.s32.totalorder %s24_s22, 4   ;;  %s2327_s17 = smov %s1877_s18 }
 0x46b   : > { %s2328_s18 = smov %s1881_s19  ;;  %s2329_s19 = smov %s2014_s30 }
 0x46c   : > { %s2330_s20 = smov %s1889_s21  ;;  %23 = sbr.rel (!%p21_p5) target bundleno = 6 (0x6), region = 113 }
 0x46f   : > { %s2331_s21 = smov %s2326_s27 }
 0x473   :  { %1446 = vsyncpa [#allocation6], 1 }
 0x474   :  { %1448 = vsyncpa [#allocation6 + $0x1], 1 }

</bundles_post_ra>
